<compile_context>
chip_gen: v7x
topology: tpu7x:2x2x1
jax: 0.10.0
libtpu: 0.0.40
codegen_flags: <defaults>
</compile_context>

<pallas_src>
import jax
import jax.numpy as jnp
from jax.experimental import pallas as pl
from jax.experimental.pallas import tpu as pltpu

C_IN, K, STRIDE, C_OUT = 3, 5, 2, 6
POOL = 2


def _round_up(x, m):
    return ((x + m - 1) // m) * m


def _cnn_kernel(patches_ref, wbig_ref, bc_ref, w2_ref, b2_ref, out_ref):
    # patches_ref: (1, 4*Bt, nwin*75)  rows ordered (pool_offset, image); each row
    #                                  holds all nwin window-patches of that image.
    # wbig_ref:    (nwin*75, nwin*6)   block-diagonal im2col conv weight
    # bc_ref:      (1, nwin*6)         conv bias tiled per window (idx = win*6+oc)
    # w2_ref:      (nwin*6, out)       permuted linear weight (row = win*6+oc)
    # b2_ref:      (1, out)            linear bias
    # out_ref:     (1, Bt, out)
    a = patches_ref[0]                                    # (4*Bt, nwin*75)
    bt = a.shape[0] // (POOL * POOL)

    # Conv for all 4 pooling offsets and all Bt images: a single MXU matmul.
    y = jnp.dot(a, wbig_ref[...], preferred_element_type=jnp.float32)
    y = jnp.maximum(y + bc_ref[...], 0.0)                 # bias + ReLU, once (VPU)

    # MaxPool2d(2): elementwise max over the 4 pool-offset row groups
    # (static slices at multiples of Bt -- Bt is a multiple of 8, tile aligned).
    pooled = jnp.maximum(
        jnp.maximum(y[0 * bt:1 * bt], y[1 * bt:2 * bt]),
        jnp.maximum(y[2 * bt:3 * bt], y[3 * bt:4 * bt]))  # (Bt, nwin*6)

    # Flatten + Linear as a second MXU matmul.
    out_ref[0] = (jnp.dot(pooled, w2_ref[...], preferred_element_type=jnp.float32)
                  + b2_ref[...])


def cnn_forward(x, conv_w, conv_b, fc_w, fc_b):
    """x: (B, 3, H, W) NCHW float32.  Returns (B, out_size) float32."""
    B, C, H, W = x.shape
    assert C == C_IN
    OH = (H - K) // STRIDE + 1
    OW = (W - K) // STRIDE + 1
    PH, PW = OH // POOL, OW // POOL        # PyTorch MaxPool2d(2) truncates odd dims
    out_size = fc_w.shape[0]
    npat = C * K * K                        # 75
    nwin = PH * PW                          # pooled spatial positions
    noff = POOL * POOL                      # 4 pooling offsets
    k_conv = nwin * npat                    # conv matmul contraction width
    k_mid = nwin * C_OUT                    # linear contraction width (= flatten size)

    # ---- glue: im2col, feature index = c*25 + kh*5 + kw (torch weight order) ----
    cols = []
    for kh in range(K):
        for kw in range(K):
            cols.append(x[:, :, kh:kh + STRIDE * OH:STRIDE, kw:kw + STRIDE * OW:STRIDE])
    pat = jnp.stack(cols, axis=-1)                                   # (B, C, OH, OW, 25)
    pat = pat.transpose(0, 2, 3, 1, 4).reshape(B, OH, OW, npat)      # (B, OH, OW, 75)
    pat = pat[:, :PH * POOL, :PW * POOL, :]                          # torch pool truncation
    pat = pat.reshape(B, PH, POOL, PW, POOL, npat)
    pat = pat.transpose(0, 2, 4, 1, 3, 5).reshape(B, noff, k_conv)   # (B, 4, nwin*75)

    # ---- batch tiling: Bt multiple of 8; >=2 grid steps when possible (v7x 2 TCs) ----
    B8 = _round_up(B, 8)
    Bt = min(128, B8)
    if B8 > 8 and B8 // Bt < 2:
        Bt = max(8, _round_up(B8 // 2, 8))
    B_pad = _round_up(B8, Bt)
    G = B_pad // Bt
    pat = jnp.pad(pat, ((0, B_pad - B), (0, 0), (0, 0)))
    pat = (pat.reshape(G, Bt, noff, k_conv)
              .transpose(0, 2, 1, 3)                                 # offset-major rows
              .reshape(G, noff * Bt, k_conv))

    # ---- weights: conv as block-diagonal matmul; fc permuted to (nwin*6, out) ----
    wc = conv_w.reshape(C_OUT, npat).T.astype(jnp.float32)           # (75, 6)
    wbig = jnp.kron(jnp.eye(nwin, dtype=jnp.float32), wc)            # (nwin*75, nwin*6)
    bcb = jnp.tile(conv_b, nwin).reshape(1, k_mid)                   # (1, nwin*6)
    # torch flatten of (B, 6, PH, PW): feature f = oc*nwin + win;  our column = win*6+oc
    w2 = fc_w.reshape(out_size, C_OUT, nwin).transpose(2, 1, 0).reshape(k_mid, out_size)
    b2 = fc_b.reshape(1, out_size)

    out = pl.pallas_call(
        _cnn_kernel,
        out_shape=jax.ShapeDtypeStruct((G, Bt, out_size), jnp.float32),
        grid=(G,),
        in_specs=[
            pl.BlockSpec((1, noff * Bt, k_conv), lambda g: (g, 0, 0)),
            pl.BlockSpec((k_conv, k_mid), lambda g: (0, 0)),
            pl.BlockSpec((1, k_mid), lambda g: (0, 0)),
            pl.BlockSpec((k_mid, out_size), lambda g: (0, 0)),
            pl.BlockSpec((1, out_size), lambda g: (0, 0)),
        ],
        out_specs=pl.BlockSpec((1, Bt, out_size), lambda g: (g, 0, 0)),
        compiler_params=pltpu.CompilerParams(dimension_semantics=("parallel",)),
    )(pat, wbig, bcb, w2, b2)

    return out.reshape(B_pad, out_size)[:B]


def reference_forward(x, conv_w, conv_b, fc_w, fc_b):
    """Pure-JAX reference with PyTorch NCHW semantics."""
    y = jax.lax.conv_general_dilated(
        x, conv_w, (STRIDE, STRIDE), "VALID",
        dimension_numbers=("NCHW", "OIHW", "NCHW"))
    y = y + conv_b[None, :, None, None]
    y = jnp.maximum(y, 0.0)
    y = jax.lax.reduce_window(y, -jnp.inf, jax.lax.max,
                              (1, 1, POOL, POOL), (1, 1, POOL, POOL), "VALID")
    y = y.reshape(y.shape[0], -1)                         # torch.flatten(x, 1)
    return y @ fc_w.T + fc_b


if __name__ == "__main__":
    B, H, W = 2, 16, 16
    out_size = 8

    key = jax.random.PRNGKey(0)
    kx, kw1, kb1, kw2, kb2 = jax.random.split(key, 5)

    x = jax.random.normal(kx, (B, C_IN, H, W), jnp.float32)
    conv_w = jax.random.normal(kw1, (C_OUT, C_IN, K, K), jnp.float32) * 0.1
    conv_b = jax.random.normal(kb1, (C_OUT,), jnp.float32) * 0.1
    OH = (H - K) // STRIDE + 1
    OW = (W - K) // STRIDE + 1
    feat = C_OUT * (OH // POOL) * (OW // POOL)            # 6 * 3 * 3 = 54 (LazyLinear in_features)
    fc_w = jax.random.normal(kw2, (out_size, feat), jnp.float32) * 0.1
    fc_b = jax.random.normal(kb2, (out_size,), jnp.float32) * 0.1

    out = jax.block_until_ready(cnn_forward(x, conv_w, conv_b, fc_w, fc_b))
    ref = reference_forward(x, conv_w, conv_b, fc_w, fc_b)

    assert out.shape == (B, out_size)
    assert jnp.allclose(out, ref, atol=1e-3, rtol=1e-3), (out, ref)
    print("KERNEL_OK")
</pallas_src>

<mosaic_0001>
module attributes {stable_mosaic.version = 11 : i64} {
  func.func @_cnn_kernel(%arg0: i32, %arg1: memref<1x32x675xf32, #tpu.memory_space<vmem>>, %arg2: memref<675x54xf32, #tpu.memory_space<vmem>>, %arg3: memref<1x54xf32, #tpu.memory_space<vmem>>, %arg4: memref<54x8xf32, #tpu.memory_space<vmem>>, %arg5: memref<1x8xf32, #tpu.memory_space<vmem>>, %arg6: memref<1x8x8xf32, #tpu.memory_space<vmem>>) attributes {dimension_semantics = [#tpu.dimension_semantics<parallel>], iteration_bounds = array<i64: 1>, scalar_prefetch = 0 : i64, scratch_operands = 0 : i64, tpu.core_type = #tpu.core_type<tc>, window_params = [{transform_indices = @transform_0, window_bounds = array<i64: 1, 32, 675>}, {pipeline_mode = #tpu.pipeline_mode<synchronous>, transform_indices = @transform_1, window_bounds = array<i64: 675, 54>}, {pipeline_mode = #tpu.pipeline_mode<synchronous>, transform_indices = @transform_2, window_bounds = array<i64: 1, 54>}, {pipeline_mode = #tpu.pipeline_mode<synchronous>, transform_indices = @transform_3, window_bounds = array<i64: 54, 8>}, {pipeline_mode = #tpu.pipeline_mode<synchronous>, transform_indices = @transform_4, window_bounds = array<i64: 1, 8>}, {transform_indices = @transform_5, window_bounds = array<i64: 1, 8, 8>}]} {
    %c0 = arith.constant 0 : index
    %c0_0 = arith.constant 0 : index
    %c0_1 = arith.constant 0 : index
    %0 = vector.load %arg1[%c0, %c0_0, %c0_1] : memref<1x32x675xf32, #tpu.memory_space<vmem>>, vector<1x32x675xf32>
    %1 = vector.shape_cast %0 : vector<1x32x675xf32> to vector<32x675xf32>
    %c0_2 = arith.constant 0 : index
    %c0_3 = arith.constant 0 : index
    %2 = vector.load %arg2[%c0_2, %c0_3] : memref<675x54xf32, #tpu.memory_space<vmem>>, vector<675x54xf32>
    %cst = arith.constant dense<0.000000e+00> : vector<32x54xf32>
    %3 = tpu.matmul %1, %2, %cst {dimension_numbers = #tpu.dot_dimension_numbers<[1], [0], [0], [1], [0, 0, 1, 1], [], []>} : vector<32x675xf32>, vector<675x54xf32>, vector<32x54xf32> -> vector<32x54xf32>
    %c0_4 = arith.constant 0 : index
    %c0_5 = arith.constant 0 : index
    %4 = vector.load %arg3[%c0_4, %c0_5] : memref<1x54xf32, #tpu.memory_space<vmem>>, vector<1x54xf32>
    %5 = vector.broadcast %4 : vector<1x54xf32> to vector<32x54xf32>
    %6 = arith.addf %3, %5 : vector<32x54xf32>
    %cst_6 = arith.constant 0.000000e+00 : f32
    %7 = vector.broadcast %cst_6 : f32 to vector<32x54xf32>
    %8 = arith.maximumf %6, %7 : vector<32x54xf32>
    %9 = vector.extract_strided_slice %8 {offsets = [0, 0], sizes = [8, 54], strides = [1, 1]} : vector<32x54xf32> to vector<8x54xf32>
    %10 = vector.extract_strided_slice %8 {offsets = [8, 0], sizes = [8, 54], strides = [1, 1]} : vector<32x54xf32> to vector<8x54xf32>
    %11 = arith.maximumf %9, %10 : vector<8x54xf32>
    %12 = vector.extract_strided_slice %8 {offsets = [16, 0], sizes = [8, 54], strides = [1, 1]} : vector<32x54xf32> to vector<8x54xf32>
    %13 = vector.extract_strided_slice %8 {offsets = [24, 0], sizes = [8, 54], strides = [1, 1]} : vector<32x54xf32> to vector<8x54xf32>
    %14 = arith.maximumf %12, %13 : vector<8x54xf32>
    %15 = arith.maximumf %11, %14 : vector<8x54xf32>
    %c0_7 = arith.constant 0 : index
    %c0_8 = arith.constant 0 : index
    %16 = vector.load %arg4[%c0_7, %c0_8] : memref<54x8xf32, #tpu.memory_space<vmem>>, vector<54x8xf32>
    %cst_9 = arith.constant dense<0.000000e+00> : vector<8x8xf32>
    %17 = tpu.matmul %15, %16, %cst_9 {dimension_numbers = #tpu.dot_dimension_numbers<[1], [0], [0], [1], [0, 0, 1, 1], [], []>} : vector<8x54xf32>, vector<54x8xf32>, vector<8x8xf32> -> vector<8x8xf32>
    %c0_10 = arith.constant 0 : index
    %c0_11 = arith.constant 0 : index
    %18 = vector.load %arg5[%c0_10, %c0_11] : memref<1x8xf32, #tpu.memory_space<vmem>>, vector<1x8xf32>
    %19 = vector.broadcast %18 : vector<1x8xf32> to vector<8x8xf32>
    %20 = arith.addf %17, %19 : vector<8x8xf32>
    %c0_12 = arith.constant 0 : index
    %c0_13 = arith.constant 0 : index
    %c0_14 = arith.constant 0 : index
    %21 = vector.load %arg6[%c0_12, %c0_13, %c0_14] : memref<1x8x8xf32, #tpu.memory_space<vmem>>, vector<1x8x8xf32>
    %22 = vector.shape_cast %21 : vector<1x8x8xf32> to vector<8x8xf32>
    %23 = vector.shape_cast %20 : vector<8x8xf32> to vector<1x8x8xf32>
    tpu.vector_store %arg6[%c0_12, %c0_13, %c0_14], %23 {strides = array<i32>} : memref<1x8x8xf32, #tpu.memory_space<vmem>>, vector<1x8x8xf32>,
    return
  }
  func.func @transform_0(%arg0: i32) -> (i32, i32, i32) {
    %c0_i32 = arith.constant 0 : i32
    %c0_i32_0 = arith.constant 0 : i32
    %c0_i32_1 = arith.constant 0 : i32
    return %arg0, %c0_i32, %c0_i32_0 : i32, i32, i32
  }
  func.func @transform_1(%arg0: i32) -> (i32, i32) {
    %c0_i32 = arith.constant 0 : i32
    %c0_i32_0 = arith.constant 0 : i32
    %c0_i32_1 = arith.constant 0 : i32
    return %c0_i32, %c0_i32_0 : i32, i32
  }
  func.func @transform_2(%arg0: i32) -> (i32, i32) {
    %c0_i32 = arith.constant 0 : i32
    %c0_i32_0 = arith.constant 0 : i32
    %c0_i32_1 = arith.constant 0 : i32
    return %c0_i32, %c0_i32_0 : i32, i32
  }
  func.func @transform_3(%arg0: i32) -> (i32, i32) {
    %c0_i32 = arith.constant 0 : i32
    %c0_i32_0 = arith.constant 0 : i32
    %c0_i32_1 = arith.constant 0 : i32
    return %c0_i32, %c0_i32_0 : i32, i32
  }
  func.func @transform_4(%arg0: i32) -> (i32, i32) {
    %c0_i32 = arith.constant 0 : i32
    %c0_i32_0 = arith.constant 0 : i32
    %c0_i32_1 = arith.constant 0 : i32
    return %c0_i32, %c0_i32_0 : i32, i32
  }
  func.func @transform_5(%arg0: i32) -> (i32, i32, i32) {
    %c0_i32 = arith.constant 0 : i32
    %c0_i32_0 = arith.constant 0 : i32
    %c0_i32_1 = arith.constant 0 : i32
    return %arg0, %c0_i32, %c0_i32_0 : i32, i32, i32
  }
}

</mosaic_0001>

<bundles_post_ra>
// kernel: tpu_custom_call.1
= control target key start
LH: loop header
LB: loop body
LE: loop exit
PB: predicated region body
PF: predicated region fallthrough
CT: control target
= control target key end

     0   :  { %v777_v7 = vmov 0.0|0.0   ;;  %vm137_vm0 = vcmask 285696   ;;  %s1197_s0 = inlined_call_operand.vmem [shape: f32[1,32,675], index: 0, kind: input, shape index: {}]   ;;  %s1198_s1 = inlined_call_operand.vmem [shape: f32[675,54], index: 1, kind: input, shape index: {}]   ;;  %s1199_s2 = inlined_call_operand.vmem [shape: f32[1,54], index: 2, kind: input, shape index: {}]   ;;  %s1200_s3 = inlined_call_operand.vmem [shape: f32[54,8], index: 3, kind: input, shape index: {}]   ;;  %s1201_s4 = inlined_call_operand.vmem [shape: f32[1,8], index: 4, kind: input, shape index: {}]   ;;  %s1202_s5 = inlined_call_operand.hbm [shape: f32[1,8,8], index: 5, kind: output, shape index: {}]  }
   0x1   :  { %v61_v0 = vld [vmem:[%s1198_s1 + $0x80] sm:$0xff]  ;;  %v62_v1 = vld [vmem:[%s1198_s1 + $0x88] sm:$0xff]  ;;  %v63_v5 = vld [vmem:[%s1198_s1 + $0x90] sm:$0xff]  ;;  %710 = vmatprep.subr.bf16.mxu0 %v777_v7 }
   0x2   :  { %v45_v2 = vld [vmem:[%s1198_s1] sm:$0xff]  ;;  %v646_v3 = vpack.c.bf16 %v62_v1, %v61_v0  ;;  %v46_v4 = vld [vmem:[%s1198_s1 + $0x8] sm:$0xff]  ;;  %v64_v6 = vld [vmem:[%s1198_s1 + $0x98] sm:$0xff] }
   0x3   :  { %v648_v8 = vpack.c.bf16 %v46_v4, %v45_v2  ;;  %v650_v9 = vpack.c.bf16 %v64_v6, %v63_v5  ;;  %v47_v10 = vld [vmem:[%s1198_s1 + $0x10] sm:$0xff]  ;;  %v48_v11 = vld [vmem:[%s1198_s1 + $0x18] sm:$0xff]  ;;  %v65_v12 = vld [vmem:[%s1198_s1 + $0xa0] sm:$0xff] }
   0x4   :  { %647 = vmatprep.subr.bf16.mxu1 %v646_v3  ;;  %v66_v13 = vld [vmem:[%s1198_s1 + $0xa8] sm:$0xff]  ;;  %v652_v14 = vpack.c.bf16 %v48_v11, %v47_v10  ;;  %v49_v16 = vld [vmem:[%s1198_s1 + $0x20] sm:$0xff]  ;;  %v67_v18 = vld [vmem:[%s1198_s1 + $0xb0] sm:$0xff] }
   0x5   :  { %649 = vmatpush3.bf16.msra.mxu1 %v648_v8  ;;  %v654_v15 = vpack.c.bf16 %v66_v13, %v65_v12  ;;  %v50_v17 = vld [vmem:[%s1198_s1 + $0x28] sm:$0xff]  ;;  %v68_v19 = vld [vmem:[%s1198_s1 + $0xb8] sm:$0xff]  ;;  %v51_v21 = vld [vmem:[%s1198_s1 + $0x30] sm:$0xff] }
   0x6   :  { %651 = vmatprep.subr.bf16.mxu1 %v650_v9  ;;  %v656_v20 = vpack.c.bf16 %v50_v17, %v49_v16  ;;  %v658_v22 = vpack.c.bf16 %v68_v19, %v67_v18  ;;  %v52_v23 = vld [vmem:[%s1198_s1 + $0x38] sm:$0xff]  ;;  %v109_v24 = vld [vmem:[%s1198_s1 + $0x200] sm:$0xff]  ;;  %v110_v25 = vld [vmem:[%s1198_s1 + $0x208] sm:$0xff] }
   0x7   :  { %v69_v26 = vld [vmem:[%s1198_s1 + $0xc0] sm:$0xff]  ;;  %v70_v27 = vld [vmem:[%s1198_s1 + $0xc8] sm:$0xff]  ;;  %v711_v28 = vpack.c.bf16 %v110_v25, %v109_v24  ;;  %v111_v30 = vld [vmem:[%s1198_s1 + $0x210] sm:$0xff]  ;;  %v660_v31 = vpack.c.bf16 %v52_v23, %v51_v21 }
   0x8   :  { %v22_v29 = vld [vmem:[%s1197_s0 + $0x8] sm:$0xff]  ;;  %v112_v32 = vld [vmem:[%s1198_s1 + $0x218] sm:$0xff]  ;;  %v662_v33 = vpack.c.bf16 %v70_v27, %v69_v26  ;;  %v53_v34 = vld [vmem:[%s1198_s1 + $0x40] sm:$0xff] }
   0x9   :  { %653 = vmatpush3.bf16.msra.mxu1 %v652_v14  ;;  %712 = vmatpush1.bf16.msra.mxu0 %v711_v28  ;;  %v54_v35 = vld [vmem:[%s1198_s1 + $0x48] sm:$0xff]  ;;  %v71_v36 = vld [vmem:[%s1198_s1 + $0xd0] sm:$0xff]  ;;  %v714_v37 = vpack.c.bf16 %v112_v32, %v111_v30  ;;  %v72_v38 = vld [vmem:[%s1198_s1 + $0xd8] sm:$0xff] }
   0xa   :  { %655 = vmatprep.subr.bf16.mxu1 %v654_v15  ;;  %713 = vmatprep.subr.bf16.mxu0 %v777_v7  ;;  %v113_v39 = vld [vmem:[%s1198_s1 + $0x220] sm:$0xff]  ;;  %v114_v40 = vld [vmem:[%s1198_s1 + $0x228] sm:$0xff]  ;;  %v664_v41 = vpack.c.bf16 %v54_v35, %v53_v34  ;;  %v55_v42 = vld [vmem:[%s1198_s1 + $0x50] sm:$0xff]  ;;  %v666_v44 = vpack.c.bf16 %v72_v38, %v71_v36 }
   0xb   :  { %218 = vmatprep.mubr.f32.mxu1 %v22_v29  ;;  %v717_v43 = vpack.c.bf16 %v114_v40, %v113_v39  ;;  %v56_v45 = vld [vmem:[%s1198_s1 + $0x58] sm:$0xff]  ;;  %v115_v46 = vld [vmem:[%s1198_s1 + $0x230] sm:$0xff]  ;;  %v73_v48 = vld [vmem:[%s1198_s1 + $0xe0] sm:$0xff] }
   0xc   :  { %v116_v47 = vld [vmem:[%s1198_s1 + $0x238] sm:$0xff]  ;;  %v74_v49 = vld [vmem:[%s1198_s1 + $0xe8] sm:$0xff]  ;;  %v668_v50 = vpack.c.bf16 %v56_v45, %v55_v42  ;;  %v57_v51 = vld [vmem:[%s1198_s1 + $0x60] sm:$0xff] }
   0xd   :  { %657 = vmatpush3.bf16.msra.mxu1 %v656_v20  ;;  %715 = vmatpush1.bf16.msra.mxu0 %v714_v37  ;;  %v720_v52 = vpack.c.bf16 %v116_v47, %v115_v46  ;;  %v670_v53 = vpack.c.bf16 %v74_v49, %v73_v48  ;;  %v58_v54 = vld [vmem:[%s1198_s1 + $0x68] sm:$0xff]  ;;  %v117_v55 = vld [vmem:[%s1198_s1 + $0x240] sm:$0xff]  ;;  %v75_v57 = vld [vmem:[%s1198_s1 + $0xf0] sm:$0xff] }
   0xe   :  { %659 = vmatprep.subr.bf16.mxu1 %v658_v22  ;;  %716 = vmatprep.subr.bf16.mxu0 %v777_v7  ;;  %v118_v56 = vld [vmem:[%s1198_s1 + $0x248] sm:$0xff]  ;;  %v76_v58 = vld [vmem:[%s1198_s1 + $0xf8] sm:$0xff]  ;;  %v672_v59 = vpack.c.bf16 %v58_v54, %v57_v51  ;;  %v59_v60 = vld [vmem:[%s1198_s1 + $0x70] sm:$0xff] }
   0xf   :  { %v723_v61 = vpack.c.bf16 %v118_v56, %v117_v55  ;;  %v674_v62 = vpack.c.bf16 %v76_v58, %v75_v57  ;;  %v60_v63 = vld [vmem:[%s1198_s1 + $0x78] sm:$0xff]  ;;  %v119_v0 = vld [vmem:[%s1198_s1 + $0x250] sm:$0xff]  ;;  %v93_v2 = vld [vmem:[%s1198_s1 + $0x180] sm:$0xff] }
  0x10   :  { %v120_v1 = vld [vmem:[%s1198_s1 + $0x258] sm:$0xff]  ;;  %v94_v3 = vld [vmem:[%s1198_s1 + $0x188] sm:$0xff]  ;;  %v676_v4 = vpack.c.bf16 %v60_v63, %v59_v60  ;;  %v77_v8 = vld [vmem:[%s1198_s1 + $0x100] sm:$0xff] }
  0x11   :  { %661 = vmatpush3.bf16.msra.mxu1 %v660_v31  ;;  %718 = vmatpush1.bf16.msra.mxu0 %v717_v43  ;;  %v726_v5 = vpack.c.bf16 %v120_v1, %v119_v0  ;;  %v678_v6 = vpack.c.bf16 %v94_v3, %v93_v2  ;;  %v78_v9 = vld [vmem:[%s1198_s1 + $0x108] sm:$0xff]  ;;  %v95_v10 = vld [vmem:[%s1198_s1 + $0x190] sm:$0xff]  ;;  %v96_v11 = vld [vmem:[%s1198_s1 + $0x198] sm:$0xff] }
  0x12   :  { %663 = vmatprep.subr.bf16.mxu1 %v662_v33  ;;  %719 = vmatprep.subr.bf16.mxu0 %v777_v7  ;;  %v121_v12 = vld [vmem:[%s1198_s1 + $0x260] sm:$0xff]  ;;  %v122_v13 = vld [vmem:[%s1198_s1 + $0x268] sm:$0xff]  ;;  %v680_v15 = vpack.c.bf16 %v78_v9, %v77_v8  ;;  %v79_v16 = vld [vmem:[%s1198_s1 + $0x110] sm:$0xff]  ;;  %v682_v18 = vpack.c.bf16 %v96_v11, %v95_v10 }
  0x13   :  { %v21_v14 = vld [vmem:[%s1197_s0] sm:$0xff]  ;;  %v26_v17 = vld [vmem:[%s1197_s0 + $0x28] sm:$0xff]  ;;  %v80_v19 = vld [vmem:[%s1198_s1 + $0x118] sm:$0xff]  ;;  %v729_v22 = vpack.c.bf16 %v122_v13, %v121_v12 }
  0x14   :  { %v97_v20 = vld [vmem:[%s1198_s1 + $0x1a0] sm:$0xff]  ;;  %v28_v21 = vld [vmem:[%s1197_s0 + $0x38] sm:$0xff]  ;;  %v98_v23 = vld [vmem:[%s1198_s1 + $0x1a8] sm:$0xff]  ;;  %526 = vmatprep.mubr.msk.f32.mxu0 %vm137_vm0, %v26_v17  ;;  %v684_v26 = vpack.c.bf16 %v80_v19, %v79_v16 }
  0x15   :  { %665 = vmatpush3.bf16.msra.mxu1 %v664_v41  ;;  %721 = vmatpush1.bf16.msra.mxu0 %v720_v52  ;;  %v123_v24 = vld [vmem:[%s1198_s1 + $0x270] sm:$0xff]  ;;  %v124_v25 = vld [vmem:[%s1198_s1 + $0x278] sm:$0xff]  ;;  %v81_v27 = vld [vmem:[%s1198_s1 + $0x120] sm:$0xff] }
  0x16   :  { %667 = vmatprep.subr.bf16.mxu1 %v666_v44  ;;  %722 = vmatprep.subr.bf16.mxu0 %v777_v7  ;;  %v27_v28 = vld [vmem:[%s1197_s0 + $0x30] sm:$0xff] }
  0x19   :  { %669 = vmatpush3.bf16.msra.mxu1 %v668_v50  ;;  %724 = vmatpush1.bf16.msra.mxu0 %v723_v61 }
  0x1a   :  { %671 = vmatprep.subr.bf16.mxu1 %v670_v53  ;;  %725 = vmatprep.subr.bf16.mxu0 %v777_v7 }
  0x1d   :  { %673 = vmatpush3.bf16.msra.mxu1 %v672_v59  ;;  %727 = vmatpush1.bf16.msra.mxu0 %v726_v5 }
  0x1e   :  { %675 = vmatprep.subr.bf16.mxu1 %v674_v62  ;;  %728 = vmatprep.subr.bf16.mxu0 %v777_v7 }
  0x21   :  { %677 = vmatpush3.bf16.msra.mxu1 %v676_v4 }
  0x22   :  { %679 = vmatprep.subr.bf16.mxu1 %v678_v6 }
  0x24   :  { %219 = vmatmul.mubr.f32.vlgmr.msra.gmra.mrb[0].mxu1 %v21_v14 }
  0x25   :  { %681 = vmatpush3.bf16.msra.mxu1 %v680_v15  ;;  %223 = vmatprep.mubr.f32.mxu1 %v28_v21 }
  0x26   :  { %10 = vsyncpa [#allocation3], 0  ;;  %683 = vmatprep.subr.bf16.mxu1 %v682_v18  ;;  %v686_v29 = vpack.c.bf16 %v98_v23, %v97_v20  ;;  %v82_v30 = vld [vmem:[%s1198_s1 + $0x128] sm:$0xff]  ;;  %v99_v31 = vld [vmem:[%s1198_s1 + $0x1b0] sm:$0xff]  ;;  %730 = vmatpush1.bf16.msra.mxu0 %v729_v22  ;;  %v732_v33 = vpack.c.bf16 %v124_v25, %v123_v24  ;;  %v778_v63 = vmov 0.0   ;;  %vm150_vm1 = vcmask 1042432  }
  0x27   :  { %v34_v32 = vld [vmem:[%s1197_s0 + $0x68] sm:$0xff]  ;;  %v100_v34 = vld [vmem:[%s1198_s1 + $0x1b8] sm:$0xff]  ;;  %731 = vmatprep.subr.bf16.mxu0 %v777_v7  ;;  %v125_v35 = vld [vmem:[%s1198_s1 + $0x280] sm:$0xff]  ;;  %v688_v37 = vpack.c.bf16 %v82_v30, %v81_v27  ;;  %vm434_vm2 = vcmask 1045504   ;;  %vm779_vm3 = vmmov 0   ;;  %vm430_vm4 = vcmask 441344  }
  0x28   :  { %v126_v36 = vld [vmem:[%s1198_s1 + $0x288] sm:$0xff]  ;;  %224 = vmatmul.mubr.f32.gmra.mrb[2].mxu1 %v27_v28  ;;  %v83_v38 = vld [vmem:[%s1198_s1 + $0x130] sm:$0xff]  ;;  %v33_v39 = vld [vmem:[%s1197_s0 + $0x60] sm:$0xff]  ;;  %v690_v40 = vpack.c.bf16 %v100_v34, %v99_v31  ;;  %s780_s24 = smov [#allocation2]   ;;  %vm508_vm5 = vcmask 64512  }
  0x29   :  { %685 = vmatpush3.bf16.msra.mxu1 %v684_v26  ;;  %228 = vmatprep.mubr.f32.mxu1 %v34_v32  ;;  %v84_v41 = vld [vmem:[%s1198_s1 + $0x138] sm:$0xff]  ;;  %v101_v42 = vld [vmem:[%s1198_s1 + $0x1c0] sm:$0xff]  ;;  %v735_v44 = vpack.c.bf16 %v126_v36, %v125_v35  ;;  %v102_v45 = vld [vmem:[%s1198_s1 + $0x1c8] sm:$0xff]  ;;  %s516_s25 = sshll.u32 %s780_s24, 4  ;;  %s517_s25 = int_to_ptr.vmem [resolvable:$true] %s516_s25 }
  0x2a   :  { %687 = vmatprep.subr.bf16.mxu1 %v686_v29  ;;  %733 = vmatpush1.bf16.msra.mxu0 %v732_v33  ;;  %v40_v43 = vld [vmem:[%s1197_s0 + $0x98] sm:$0xff]  ;;  %v127_v46 = vld [vmem:[%s1198_s1 + $0x290] sm:$0xff]  ;;  %v692_v48 = vpack.c.bf16 %v84_v41, %v83_v38  ;;  %v694_v50 = vpack.c.bf16 %v102_v45, %v101_v42  ;;  %v85_v51 = vld [vmem:[%s1198_s1 + $0x140] sm:$0xff]  ;;  %s753_s26 = scalar_lea.vmem %s517_s25, 128  ;;  %p758_p1 = scmp.lt.s32.totalorder %s517_s25, %s517_s25 }
  0x2b   :  { %734 = vmatprep.subr.bf16.mxu0 %v777_v7  ;;  %v128_v47 = vld [vmem:[%s1198_s1 + $0x298] sm:$0xff]  ;;  %v39_v49 = vld [vmem:[%s1197_s0 + $0x90] sm:$0xff]  ;;  %v86_v52 = vld [vmem:[%s1198_s1 + $0x148] sm:$0xff]  ;;  %p754_p0 = scmp.ne.s32.totalorder %s517_s25, %s753_s26  ;;  %p759_p2 = scmp.lt.s32.totalorder %s753_s26, %s753_s26 }
  0x2c   :  { %229 = vmatmul.mubr.f32.gmra.mrb[4].mxu1 %v33_v39  ;;  %v24_v53 = vld [vmem:[%s1197_s0 + $0x18] sm:$0xff]  ;;  %v738_v54 = vpack.c.bf16 %v128_v47, %v127_v46  ;;  %v103_v55 = vld [vmem:[%s1198_s1 + $0x1d0] sm:$0xff]  ;;  %v696_v57 = vpack.c.bf16 %v86_v52, %v85_v51  ;;  %v105_v61 = vld [vmem:[%s1198_s1 + $0x1e0] sm:$0xff] }
  0x2d   :  { %689 = vmatpush3.bf16.msra.mxu1 %v688_v37  ;;  %233 = vmatprep.mubr.f32.mxu1 %v40_v43  ;;  %v104_v56 = vld [vmem:[%s1198_s1 + $0x1d8] sm:$0xff]  ;;  %v87_v59 = vld [vmem:[%s1198_s1 + $0x150] sm:$0xff]  ;;  %v106_v62 = vld [vmem:[%s1198_s1 + $0x1e8] sm:$0xff]  ;;  %p760_p3 = por %p759_p2, %p758_p1 }
  0x2e   :  { %691 = vmatprep.subr.bf16.mxu1 %v690_v40  ;;  %736 = vmatpush1.bf16.msra.mxu0 %v735_v44  ;;  %v698_v58 = vpack.c.bf16 %v104_v56, %v103_v55  ;;  %v88_v60 = vld [vmem:[%s1198_s1 + $0x158] sm:$0xff]  ;;  %v129_v0 = vld [vmem:[%s1198_s1 + $0x2a0] sm:$0x7]  ;;  %v702_v4 = vpack.c.bf16 %v106_v62, %v105_v61  ;;  %v90_v6 = vld [vmem:[%s1198_s1 + $0x168] sm:$0xff] }
  0x2f   :  { %737 = vmatprep.subr.bf16.mxu0 %v777_v7  ;;  %v25_v1 = vld [vmem:[%s1197_s0 + $0x20] sm:$0xff]  ;;  %v700_v2 = vpack.c.bf16 %v88_v60, %v87_v59  ;;  %v32_v3 = vld [vmem:[%s1197_s0 + $0x58] sm:$0xff]  ;;  %v107_v8 = vld [vmem:[%s1198_s1 + $0x1f0] sm:$0xff]  ;;  %p761_p4 = pnand %p760_p3, %p754_p0 }
  0x30   :  { %234 = vmatmul.mubr.f32.gmra.mrb[6].mxu1 %v39_v49  ;;  %v89_v5 = vld [vmem:[%s1198_s1 + $0x160] sm:$0xff]  ;;  %v108_v9 = vld [vmem:[%s1198_s1 + $0x1f8] sm:$0xff]  ;;  %v31_v10 = vld [vmem:[%s1197_s0 + $0x50] sm:$0xff] }
  0x31   :  { %693 = vmatpush3.bf16.msra.mxu1 %v692_v48  ;;  %303 = vmatprep.mubr.f32.mxu1 %v24_v53  ;;  %v704_v11 = vpack.c.bf16 %v90_v6, %v89_v5  ;;  %v38_v12 = vld [vmem:[%s1197_s0 + $0x88] sm:$0xff]  ;;  %v706_v13 = vpack.c.bf16 %v108_v9, %v107_v8  ;;  %v91_v14 = vld [vmem:[%s1198_s1 + $0x170] sm:$0xff]  ;;  %v92_v15 = vld [vmem:[%s1198_s1 + $0x178] sm:$0xff] }
  0x32   :  { %695 = vmatprep.subr.bf16.mxu1 %v694_v50  ;;  %739 = vmatpush1.bf16.msra.mxu0 %v738_v54  ;;  %v37_v16 = vld [vmem:[%s1197_s0 + $0x80] sm:$0xff]  ;;  %v708_v17 = vpack.c.bf16 %v92_v15, %v91_v14  ;;  %v44_v18 = vld [vmem:[%s1197_s0 + $0xb8] sm:$0xff]  ;;  %v43_v19 = vld [vmem:[%s1197_s0 + $0xb0] sm:$0xff] }
  0x33   :  { %364 = vmatprep.subr.mxu0 %v778_v63  ;;  %v23_v20 = vld [vmem:[%s1197_s0 + $0x10] sm:$0xff]  ;;  %v30_v21 = vld [vmem:[%s1197_s0 + $0x48] sm:$0xff]  ;;  %v29_v22 = vld [vmem:[%s1197_s0 + $0x40] sm:$0xff] }
  0x34   :  { %v36_v23 = vld [vmem:[%s1197_s0 + $0x78] sm:$0xff]  ;;  %v35_v24 = vld [vmem:[%s1197_s0 + $0x70] sm:$0xff]  ;;  %v42_v25 = vld [vmem:[%s1197_s0 + $0xa8] sm:$0xff] }
  0x35   :  { %697 = vmatpush3.bf16.msra.mxu1 %v696_v57  ;;  %v41_v26 = vld [vmem:[%s1197_s0 + $0xa0] sm:$0xff]  ;;  %v417_v28 = vld [vmem:[%s1200_s3 + $0x8] sm:$0xff]  ;;  %v418_v30 = vld [vmem:[%s1200_s3 + $0x10] sm:$0xff] }
  0x36   :  { %699 = vmatprep.subr.bf16.mxu1 %v698_v58  ;;  %525 = vmatpush1.msk.msra.mxu0 %vm150_vm1, %v129_v0  ;;  %v416_v27 = vld [vmem:[%s1200_s3] sm:$0xff]  ;;  %v419_v31 = vld [vmem:[%s1200_s3 + $0x18] sm:$0xff]  ;;  %v421_v34 = vld [vmem:[%s1200_s3 + $0x28] sm:$0xff] }
  0x37   :  { %389 = vmatmul.mubr.f32.vlgmr.msra.gmra.mrb[0].mxu0 %v25_v1  ;;  %740 = vmatprep.subr.bf16.mxu0 %v777_v7  ;;  %v741_v29 = vpack.c.bf16 %v417_v28, %v416_v27  ;;  %v744_v32 = vpack.c.bf16 %v419_v31, %v418_v30  ;;  %v420_v33 = vld [vmem:[%s1200_s3 + $0x20] sm:$0xff]  ;;  %v422_v36 = vld [vmem:[%s1200_s3 + $0x30] sm:$0x3f] }
  0x38   :  { %527 = vmatprep.mubr.msk.f32.mxu0 %vm137_vm0, %v32_v3  ;;  %v747_v35 = vpack.c.bf16 %v421_v34, %v420_v33  ;;  %v524_v54 = vld [vmem:[%s1199_s2] ss:$0 sm:$0xff] }
  0x39   :  { %701 = vmatpush3.bf16.msra.mxu1 %v700_v2  ;;  %742 = vmatpush3.bf16.msra.mxu0 %v741_v29 }
  0x3a   :  { %703 = vmatprep.subr.bf16.mxu1 %v702_v4  ;;  %743 = vmatprep.subr.bf16.mxu0 %v777_v7 }
  0x3b   :  { %394 = vmatmul.mubr.f32.gmra.mrb[2].mxu0 %v31_v10 }
  0x3c   :  { %528 = vmatprep.mubr.msk.f32.mxu0 %vm137_vm0, %v38_v12 }
  0x3d   :  { %705 = vmatpush3.bf16.msra.mxu1 %v704_v11  ;;  %745 = vmatpush3.bf16.msra.mxu0 %v744_v32 }
  0x3e   :  { %707 = vmatprep.subr.bf16.mxu1 %v706_v13  ;;  %746 = vmatprep.subr.bf16.mxu0 %v777_v7 }
  0x3f   :  { %399 = vmatmul.mubr.f32.gmra.mrb[4].mxu0 %v37_v16 }
  0x40   :  { %529 = vmatprep.mubr.msk.f32.mxu0 %vm137_vm0, %v44_v18 }
  0x41   :  { %709 = vmatpush3.bf16.msra.mxu1 %v708_v17  ;;  %748 = vmatpush3.bf16.msra.mxu0 %v747_v35 }
  0x42   :  { %641 = vmatprep.subr.mxu0 %v778_v63 }
  0x43   :  { %404 = vmatmul.mubr.f32.gmra.mrb[6].mxu0 %v43_v19 }
  0x44   :  { %304 = vmatmul.mubr.f32.vlgmr.msra.gmra.mrb[8].mxu1 %v23_v20  ;;  %643 = vmatprep.mubr.msk.f32.mxu0 %vm779_vm3, %v778_v63 }
  0x45   :  { %308 = vmatprep.mubr.f32.mxu1 %v30_v21  ;;  %642 = vmatpush3.msk.msra.mxu0 %vm434_vm2, %v422_v36 }
  0x48   :  { %309 = vmatmul.mubr.f32.gmra.mrb[10].mxu1 %v29_v22 }
  0x49   :  { %313 = vmatprep.mubr.f32.mxu1 %v36_v23 }
  0x4c   :  { %314 = vmatmul.mubr.f32.gmra.mrb[12].mxu1 %v35_v24 }
  0x4d   :  { %318 = vmatprep.mubr.f32.mxu1 %v42_v25  ;;  %v530_v25 = vld [vmem:[%s1201_s4] ss:$0 sm:$0xff] }
  0x50   :  { %319 = vmatmul.mubr.f32.gmra.mrb[14].mxu1 %v41_v26 }
  0xf7   :  { %v565_v7 = vpop.f32.mrb[0].mxu1 }
  0xf8   :  { %v566_v37 = vpop.f32.mrb[1].mxu1 }
  0xf9   :  { %v567_v38 = vadd.f32 %v566_v37, %v565_v7 }
  0xfb   :  { %v568_v39 = vpop.f32.mrb[2].mxu1  ;;  %v221_v59 = vadd.f32 %v567_v38, %v524_v54 }
  0xfc   :  { %v569_v40 = vpop.f32.mrb[3].mxu1 }
  0xfd   :  { %v570_v41 = vadd.f32 %v569_v40, %v568_v39 }
  0xff   :  { %v571_v42 = vpop.f32.mrb[4].mxu1  ;;  %v226_v0 = vadd.f32 %v570_v41, %v524_v54 }
 0x100   :  { %v572_v43 = vpop.f32.mrb[5].mxu1 }
 0x101   :  { %v573_v44 = vadd.f32 %v572_v43, %v571_v42 }
 0x103   :  { %v574_v45 = vpop.f32.mrb[6].mxu1  ;;  %v231_v6 = vadd.f32 %v573_v44, %v524_v54 }
 0x104   :  { %v575_v46 = vpop.f32.mrb[7].mxu1 }
 0x105   :  { %v576_v47 = vadd.f32 %v575_v46, %v574_v45 }
 0x107   :  { %v236_v15 = vadd.f32 %v576_v47, %v524_v54 }
 0x10a   :  { %v390_v48 = vpop.f32.mrb[0].mxu0 }
 0x10b   :  { %v392_v49 = vpop.f32.mrb[1].mxu0 }
 0x10e   :  { %v395_v50 = vpop.f32.mrb[2].mxu0 }
 0x10f   :  { %v397_v51 = vpop.f32.mrb[3].mxu0 }
 0x112   :  { %v400_v52 = vpop.f32.mrb[4].mxu0 }
 0x113   :  { %v402_v53 = vpop.f32.mrb[5].mxu0 }
 0x116   :  { %v405_v55 = vpop.f32.mrb[6].mxu0 }
 0x117   :  { %v609_v56 = vpop.f32.mrb[8].mxu1  ;;  %v407_v57 = vpop.f32.mrb[7].mxu0 }
 0x118   :  { %v610_v58 = vpop.f32.mrb[9].mxu1 }
 0x119   :  { %v611_v60 = vadd.f32 %v610_v58, %v609_v56 }
 0x11b   :  { %v612_v61 = vpop.f32.mrb[10].mxu1  ;;  %v306_v62 = vadd.f32 %v611_v60, %v221_v59 }
 0x11c   :  { %v613_v63 = vpop.f32.mrb[11].mxu1 }
 0x11d   :  { %v391_v1 = vadd.f32 %v390_v48, %v306_v62  ;;  %v614_v2 = vadd.f32 %v613_v63, %v612_v61 }
 0x11f   :  { %v615_v3 = vpop.f32.mrb[12].mxu1  ;;  %v311_v4 = vadd.f32 %v614_v2, %v226_v0  ;;  %v409_v10 = vmax.f32 %v391_v1, 0.0 }
 0x120   :  { %v616_v5 = vpop.f32.mrb[13].mxu1 }
 0x121   :  { %v396_v8 = vadd.f32 %v395_v50, %v311_v4  ;;  %v617_v9 = vadd.f32 %v616_v5, %v615_v3 }
 0x123   :  { %v410_v11 = vmax.f32 %v396_v8, 0.0  ;;  %v618_v12 = vpop.f32.mrb[14].mxu1  ;;  %v316_v13 = vadd.f32 %v617_v9, %v231_v6 }
 0x124   :  { %v619_v14 = vpop.f32.mrb[15].mxu1 }
 0x125   :  { %v413_v16 = vmax.f32 %v409_v10, %v410_v11  ;;  %v401_v17 = vadd.f32 %v400_v52, %v316_v13  ;;  %v620_v18 = vadd.f32 %v619_v14, %v618_v12 }
 0x127   :  { %v321_v19 = vadd.f32 %v620_v18, %v236_v15  ;;  %v411_v21 = vmax.f32 %v401_v17, 0.0 }
 0x129   :  { %v406_v20 = vadd.f32 %v405_v55, %v321_v19 }
 0x12b   :  { %v412_v22 = vmax.f32 %v406_v20, 0.0 }
 0x12d   :  { %v414_v23 = vmax.f32 %v411_v21, %v412_v22 }
 0x12f   :  { %v415_v24 = vmax.f32 %v413_v16, %v414_v23 }
 0x131   :  { %644 = vmatmul.mubr.msk.f32.vlgmr.msra.gmra.mrb[8].mxu0 %vm430_vm4, %v415_v24 }
 0x204   :  { %v504_v26 = vpop.f32.mrb[8].mxu0 }
 0x205   :  { %v505_v27 = vadd.f32 %v530_v25, %v504_v26  ;;  %v645_v28 = vpop.f32.mrb[9].mxu0 }
 0x207   :  { %509 = vst.msk [vmem:[#allocation2] sm:$0xff] %vm508_vm5, %v505_v27 }
 0x208   :  { %764 = shalt.err (!%p761_p4)
}
 0x209   :  { %s765_s29 = scalar_lea.hbm %s1202_s5, 128 }
 0x20a   :  { %p766_p5 = scmp.ne.s32.totalorder %s1202_s5, %s765_s29  ;;  %p769_p6 = scmp.lt.u32.totalorder %s765_s29, %s1202_s5 }
 0x20c   :  { %p771_p7 = pnand %p769_p6, %p766_p5 }
 0x20e   :  { %774 = shalt.err (!%p771_p7)
}
 0x20f   :  { %519 = dma.vmem_to_hbm [thread:$0]  %s517_s25, 128, %s1202_s5, [#allocation3]  }
 0x210   :  { %775 = dma.done.wait [#allocation3], 128  }
 0x211   :  { %776 = vsyncadd [#allocation3], 4294967168 }
 0x212   :  { %523 = vsyncpa [#allocation3], 1 }

</bundles_post_ra>
